<compile_context>
chip_gen: v7x
topology: tpu7x:2x2x1
jax: 0.10.0
libtpu: 0.0.40
codegen_flags: <defaults>
</compile_context>

<pallas_src>
import jax
import jax.numpy as jnp
from jax.experimental import pallas as pl
from jax.experimental.pallas import tpu as pltpu

OUT_CHANNELS = 128   # fixed by the module
BN_EPS = 1e-5

# VMEM sizing: budget the pipelined blocks at 32 MiB (fits every generation's
# scoped default except v5e's 16 MiB, which we raise below) and set the scoped
# limit to 48 MiB — above the v5e/v6e defaults, safely under v7x's 64 MiB
# physical VMEM per TensorCore.
_TILE_VMEM_BUDGET = 32 << 20
_VMEM_LIMIT_BYTES = 48 << 20


def _lraspp_kernel(x_ref, w_ref, bias_ref, o_ref):
    # x_ref:    (1, C, T)   VMEM — one spatial tile of one batch element
    # w_ref:    (2*O, C)    VMEM — [BN-scale-folded b0 weight ; b1 weight]
    # bias_ref: (O, 1)      VMEM — folded BN bias (beta - mean * scale)
    # o_ref:    (1, O, T)   VMEM
    O = OUT_CHANNELS
    x = x_ref[0]                                                       # (C, T)

    # Single fused MXU matmul for both branches, f32 accumulation.
    a = jnp.dot(w_ref[...], x, preferred_element_type=jnp.float32)    # (2O, T)

    feat1 = jnp.maximum(a[:O, :] + bias_ref[...], 0.0)                # ReLU(BN(.))
    feat2 = jax.nn.sigmoid(a[O:, :])                                  # Sigmoid(.)

    # Bilinear interpolate to the same size (align_corners=True) is identity.
    o_ref[0] = (feat1 * feat2).astype(o_ref.dtype)


def _pick_spatial_tile(hw, c, o, in_bytes, out_bytes,
                       budget_bytes=_TILE_VMEM_BUDGET, max_tile=8192):
    """Lane-dense spatial tile sized from a VMEM budget (multiple of 128)."""
    # per-spatial-column bytes: double-buffered x block + double-buffered
    # output block + f32 temporaries (a: 2*O, feat1/feat2/prod: ~3*O).
    per_col = 2 * c * in_bytes + 2 * o * out_bytes + 5 * o * 4
    t = budget_bytes // per_col
    t = (t // 128) * 128
    hw_pad = ((hw + 127) // 128) * 128
    t = max(128, min(t, min(hw_pad, max_tile)))
    return t


def lraspp_forward(x, conv0_w, conv1_w, bn_gamma, bn_beta, bn_mean, bn_var,
                   *, eps=BN_EPS):
    """x: (N, C, H, W); conv*_w: (128, C, 1, 1); bn_*: (128,)."""
    N, C, H, W = x.shape
    O = conv0_w.shape[0]
    HW = H * W

    in_bytes = jnp.dtype(x.dtype).itemsize
    out_bytes = in_bytes
    T = _pick_spatial_tile(HW, C, O, in_bytes, out_bytes)
    n_tiles = pl.cdiv(HW, T)

    # v7x has 2 TensorCores: make sure the parallel grid has >= 2 iterations.
    if N * n_tiles < 2 and HW > 128:
        T = max(128, ((pl.cdiv(HW, 2) + 127) // 128) * 128)
        n_tiles = pl.cdiv(HW, T)

    HW_pad = n_tiles * T

    # Lane-dense layout: flatten spatial dims; pad the tail tile with zeros
    # (cropped after the kernel).
    x_flat = x.reshape(N, C, HW)
    if HW_pad != HW:
        x_flat = jnp.pad(x_flat, ((0, 0), (0, 0), (0, HW_pad - HW)))

    # Fold BN (eval-mode) into the b0 weight; fuse both weights into one
    # (2*O, C) matrix; cast weights to the activation dtype so the MXU runs
    # at its native (e.g. bf16) rate when x is low precision.
    w0 = conv0_w.reshape(O, C).astype(jnp.float32)
    w1 = conv1_w.reshape(O, C).astype(jnp.float32)
    inv_std = 1.0 / jnp.sqrt(bn_var.astype(jnp.float32) + eps)
    scale = bn_gamma.astype(jnp.float32) * inv_std                      # (O,)
    bias = (bn_beta.astype(jnp.float32)
            - bn_mean.astype(jnp.float32) * scale).reshape(O, 1)        # (O,1)
    w_cat = jnp.concatenate([w0 * scale[:, None], w1], axis=0).astype(x.dtype)

    out_flat = pl.pallas_call(
        _lraspp_kernel,
        out_shape=jax.ShapeDtypeStruct((N, O, HW_pad), x.dtype),
        grid=(N, n_tiles),
        in_specs=[
            pl.BlockSpec((1, C, T), lambda n, s: (n, 0, s)),    # x tile
            pl.BlockSpec((2 * O, C), lambda n, s: (0, 0)),      # fused weights (resident)
            pl.BlockSpec((O, 1), lambda n, s: (0, 0)),          # bn bias (resident)
        ],
        out_specs=pl.BlockSpec((1, O, T), lambda n, s: (n, 0, s)),
        compiler_params=pltpu.CompilerParams(
            dimension_semantics=("parallel", "parallel"),
            vmem_limit_bytes=_VMEM_LIMIT_BYTES),
    )(x_flat, w_cat, bias)

    if HW_pad != HW:
        out_flat = out_flat[:, :, :HW]
    return out_flat.reshape(N, O, H, W)


def lraspp_reference(x, conv0_w, conv1_w, bn_gamma, bn_beta, bn_mean, bn_var,
                     *, eps=BN_EPS):
    O, C = conv0_w.shape[:2]
    w0 = conv0_w.reshape(O, C)
    w1 = conv1_w.reshape(O, C)
    f1 = jnp.einsum("oc,nchw->nohw", w0, x,
                    precision=jax.lax.Precision.HIGHEST)
    f1 = (f1 - bn_mean[None, :, None, None]) / jnp.sqrt(
        bn_var[None, :, None, None] + eps)
    f1 = f1 * bn_gamma[None, :, None, None] + bn_beta[None, :, None, None]
    f1 = jnp.maximum(f1, 0.0)
    f2 = jax.nn.sigmoid(jnp.einsum("oc,nchw->nohw", w1, x,
                                   precision=jax.lax.Precision.HIGHEST))
    # interpolate(size=same, bilinear, align_corners=True) == identity
    return f1 * f2


if __name__ == "__main__":
    key = jax.random.PRNGKey(0)
    kx, kw0, kw1, kg, kb, km, kv = jax.random.split(key, 7)

    N, C, H, W = 2, 32, 16, 16          # small shapes; out_channels fixed at 128
    x = jax.random.normal(kx, (N, C, H, W), dtype=jnp.float32)

    conv0_w = jax.random.normal(kw0, (OUT_CHANNELS, C, 1, 1), jnp.float32) * (1.0 / C) ** 0.5
    conv1_w = jax.random.normal(kw1, (OUT_CHANNELS, C, 1, 1), jnp.float32) * (1.0 / C) ** 0.5
    bn_gamma = 1.0 + 0.1 * jax.random.normal(kg, (OUT_CHANNELS,), jnp.float32)
    bn_beta = 0.1 * jax.random.normal(kb, (OUT_CHANNELS,), jnp.float32)
    bn_mean = 0.1 * jax.random.normal(km, (OUT_CHANNELS,), jnp.float32)
    bn_var = jnp.abs(jax.random.normal(kv, (OUT_CHANNELS,), jnp.float32)) + 0.5

    out = lraspp_forward(x, conv0_w, conv1_w, bn_gamma, bn_beta, bn_mean, bn_var)
    out = jax.block_until_ready(out)

    ref = lraspp_reference(x, conv0_w, conv1_w, bn_gamma, bn_beta, bn_mean, bn_var)
    assert out.shape == (N, OUT_CHANNELS, H, W)
    assert jnp.allclose(out, ref, atol=1e-3, rtol=1e-3), "mismatch vs reference"

    print("KERNEL_OK")
</pallas_src>

<mosaic_0001>
module attributes {stable_mosaic.version = 11 : i64} {
  func.func @_lraspp_kernel(%arg0: i32, %arg1: i32, %arg2: memref<1x32x256xf32, #tpu.memory_space<vmem>>, %arg3: memref<256x32xf32, #tpu.memory_space<vmem>>, %arg4: memref<128x1xf32, #tpu.memory_space<vmem>>, %arg5: memref<1x128x256xf32, #tpu.memory_space<vmem>>) attributes {dimension_semantics = [#tpu.dimension_semantics<parallel>, #tpu.dimension_semantics<parallel>], iteration_bounds = array<i64: 2, 1>, scalar_prefetch = 0 : i64, scratch_operands = 0 : i64, tpu.core_type = #tpu.core_type<tc>, window_params = [{transform_indices = @transform_0, window_bounds = array<i64: 1, 32, 256>}, {pipeline_mode = #tpu.pipeline_mode<synchronous>, transform_indices = @transform_1, window_bounds = array<i64: 256, 32>}, {pipeline_mode = #tpu.pipeline_mode<synchronous>, transform_indices = @transform_2, window_bounds = array<i64: 128, 1>}, {transform_indices = @transform_3, window_bounds = array<i64: 1, 128, 256>}]} {
    %c0 = arith.constant 0 : index
    %c0_0 = arith.constant 0 : index
    %c0_1 = arith.constant 0 : index
    %0 = vector.load %arg2[%c0, %c0_0, %c0_1] : memref<1x32x256xf32, #tpu.memory_space<vmem>>, vector<1x32x256xf32>
    %1 = vector.shape_cast %0 : vector<1x32x256xf32> to vector<32x256xf32>
    %c0_2 = arith.constant 0 : index
    %c0_3 = arith.constant 0 : index
    %2 = vector.load %arg3[%c0_2, %c0_3] : memref<256x32xf32, #tpu.memory_space<vmem>>, vector<256x32xf32>
    %cst = arith.constant dense<0.000000e+00> : vector<256x256xf32>
    %3 = tpu.matmul %2, %1, %cst {dimension_numbers = #tpu.dot_dimension_numbers<[1], [0], [0], [1], [0, 0, 1, 1], [], []>} : vector<256x32xf32>, vector<32x256xf32>, vector<256x256xf32> -> vector<256x256xf32>
    %4 = vector.extract_strided_slice %3 {offsets = [0, 0], sizes = [128, 256], strides = [1, 1]} : vector<256x256xf32> to vector<128x256xf32>
    %c0_4 = arith.constant 0 : index
    %c0_5 = arith.constant 0 : index
    %5 = vector.load %arg4[%c0_4, %c0_5] : memref<128x1xf32, #tpu.memory_space<vmem>>, vector<128x1xf32>
    %6 = vector.broadcast %5 : vector<128x1xf32> to vector<128x256xf32>
    %7 = arith.addf %4, %6 : vector<128x256xf32>
    %cst_6 = arith.constant 0.000000e+00 : f32
    %8 = vector.broadcast %cst_6 : f32 to vector<128x256xf32>
    %9 = arith.maximumf %7, %8 : vector<128x256xf32>
    %10 = vector.extract_strided_slice %3 {offsets = [128, 0], sizes = [128, 256], strides = [1, 1]} : vector<256x256xf32> to vector<128x256xf32>
    %11 = arith.negf %10 : vector<128x256xf32>
    %12 = math.exp %11 : vector<128x256xf32>
    %cst_7 = arith.constant 1.000000e+00 : f32
    %13 = vector.broadcast %cst_7 : f32 to vector<128x256xf32>
    %14 = arith.addf %13, %12 : vector<128x256xf32>
    %15 = arith.divf %13, %14 : vector<128x256xf32>
    %16 = arith.mulf %9, %15 : vector<128x256xf32>
    %c0_8 = arith.constant 0 : index
    %c0_9 = arith.constant 0 : index
    %c0_10 = arith.constant 0 : index
    %17 = vector.load %arg5[%c0_8, %c0_9, %c0_10] : memref<1x128x256xf32, #tpu.memory_space<vmem>>, vector<1x128x256xf32>
    %18 = vector.shape_cast %17 : vector<1x128x256xf32> to vector<128x256xf32>
    %19 = vector.shape_cast %16 : vector<128x256xf32> to vector<1x128x256xf32>
    tpu.vector_store %arg5[%c0_8, %c0_9, %c0_10], %19 {strides = array<i32>} : memref<1x128x256xf32, #tpu.memory_space<vmem>>, vector<1x128x256xf32>,
    return
  }
  func.func @transform_0(%arg0: i32, %arg1: i32) -> (i32, i32, i32) {
    %c0_i32 = arith.constant 0 : i32
    %c0_i32_0 = arith.constant 0 : i32
    return %arg0, %c0_i32, %arg1 : i32, i32, i32
  }
  func.func @transform_1(%arg0: i32, %arg1: i32) -> (i32, i32) {
    %c0_i32 = arith.constant 0 : i32
    %c0_i32_0 = arith.constant 0 : i32
    %c0_i32_1 = arith.constant 0 : i32
    return %c0_i32, %c0_i32_0 : i32, i32
  }
  func.func @transform_2(%arg0: i32, %arg1: i32) -> (i32, i32) {
    %c0_i32 = arith.constant 0 : i32
    %c0_i32_0 = arith.constant 0 : i32
    %c0_i32_1 = arith.constant 0 : i32
    return %c0_i32, %c0_i32_0 : i32, i32
  }
  func.func @transform_3(%arg0: i32, %arg1: i32) -> (i32, i32, i32) {
    %c0_i32 = arith.constant 0 : i32
    %c0_i32_0 = arith.constant 0 : i32
    return %arg0, %c0_i32, %arg1 : i32, i32, i32
  }
}

</mosaic_0001>

<bundles_post_ra>
// kernel: tpu_custom_call.1
= control target key start
LH: loop header
LB: loop body
LE: loop exit
PB: predicated region body
PF: predicated region fallthrough
CT: control target
= control target key end

     0   :  { %8 = vsyncpa [#allocation3], 0  ;;  %s1942_s0 = inlined_call_operand.vmem [shape: f32[2,32,256], index: 0, kind: input, shape index: {}]   ;;  %s1943_s1 = inlined_call_operand.vmem [shape: f32[256,32], index: 1, kind: input, shape index: {}]   ;;  %s1944_s2 = inlined_call_operand.vmem [shape: f32[128,1], index: 2, kind: input, shape index: {}]   ;;  %s1945_s3 = inlined_call_operand.hbm [shape: f32[2,128,256], index: 3, kind: output, shape index: {}]  }
   0x1   :  { %10 = vsyncpa [#allocation3 + $0x1], 0  ;;  %s1490_s12 = smov 0   ;;  %s1492_s13 = smov 0  }
   0x2   :  { %s1494_s14 = smov 0   ;;  %s1496_s15 = smov 0  }
   0x3   :  { %s1498_s16 = smov 0   ;;  %s1500_s17 = smov 0  }
   0x4 LB: > { %s1105_s18 = sadd.s32 4294967295, %s1463_s17   ;;  %s1106_s19 = sadd.s32 4294967294, %s1463_s17   ;;  %s1463_s17 = sphi %s1500_s17, %s16_s17   ;;  %s1459_s16 = sphi %s1498_s16, %s1952_s16   ;;  %s1455_s15 = sphi %s1496_s15, %s1951_s15   ;;  %s1451_s14 = sphi %s1494_s14, %s1950_s14   ;;  %s1447_s13 = sphi %s1492_s13, %s1949_s13   ;;  %s1443_s12 = sphi %s1490_s12, %s1948_s12  }
   0x5   : > { %s28_s20 = sadd.s32 1, %s1459_s16  ;;  %s107_s21 = sadd.s32 1, %s1451_s14 }
   0x6   : > { %p30_p0 = scmp.ge.s32.totalorder %s28_s20, 2  ;;  %p117_p1 = scmp.ne.s32.totalorder %s1451_s14, %s1447_s13 }
   0x7   : > { %p118_p2 = scmp.eq.s32.totalorder %s1105_s18, 1  ;;  %p123_p3 = scmp.ne.s32.totalorder %s1447_s13, %s1443_s12 }
   0x8   : > { %s1954_s20 = smov (%p30_p0, %s28_s20), 0  ;;  %p124_p5 = scmp.eq.s32.totalorder %s1106_s19, 1 }
   0x9   : > { %p1530_p4 = por %p118_p2, %p117_p1  ;;  %s102_s23 = ssub.s32 %s1459_s16, %s1954_s20 }
   0xa   : > { %p1109_p6 = scmp.ge.s32.totalorder %s1463_s17, 1  ;;  %p105_p7 = scmp.eq.s32.totalorder %s102_s23, 0 }
   0xb   : > { %p1537_p8 = por %p124_p5, %p123_p3  ;;  %p161_p9 = scmp.lt.s32.totalorder %s1463_s17, 3 }
   0xc   : > { %s1543_s25 = scalar_select %p105_p7, %s1451_s14, %s107_s21  }
   0xd   : > { %p162_p10 = pnand %p1109_p6, %p161_p9 }
   0xe   : > { %p190_p11 = scmp.lt.s32.totalorder (!%p162_p10), %s1455_s15, 1  ;;  %v1465_v0 = vmov (!%p162_p10), 0.0   ;;  %v1466_v1 = vmov (!%p162_p10), 0   ;;  %v594_v14 = vld [vmem:[%s1944_s2] sm:$0xff] (!%p162_p10)  ;;  %vm240_vm0 = vcmask (!%p162_p10), 261120   ;;  %v596_v17 = vld [vmem:[%s1944_s2 + $0x10] sm:$0xff] (!%p162_p10) }
   0xf   : > { %165 = sbr.rel (%p162_p10) target bundleno = 359 (0x167), region = 32  ;;  %401 = vmatprep.mubr.f32.mxu0 (!%p162_p10), %v1465_v0  ;;  %497 = vmatprep.mubr.f32.mxu1 (!%p162_p10), %v1465_v0  ;;  %v208_v15 = vld [vmem:[%s1943_s1] sm:$0xff] (!%p162_p10)  ;;  %v595_v18 = vld [vmem:[%s1944_s2 + $0x8] sm:$0xff] (!%p162_p10)  ;;  %v597_v19 = vld [vmem:[%s1944_s2 + $0x18] sm:$0xff] (!%p162_p10)  ;;  %s186_s23 = sand.u32 (!%p162_p10), 1, %s1447_s13  }
  0x10   : > { %1255 = vset.pattern.permute.xlu0 (!%p162_p10), %v1466_v1  ;;  %1256 = vset.pattern.permute.xlu1 (!%p162_p10), %v1466_v1  ;;  %v224_v16 = vld [vmem:[%s1943_s1 + $0x80] sm:$0xff] (!%p162_p10)  ;;  %v209_v20 = vld [vmem:[%s1943_s1 + $0x8] sm:$0xff] (!%p162_p10)  ;;  %v210_v24 = vld [vmem:[%s1943_s1 + $0x10] sm:$0xff] (!%p162_p10)  ;;  %s1183_s28 = sshll.u32 (!%p162_p10), %s1455_s15, 12  ;;  %s1467_s7 = smov (!%p162_p10), [#allocation2]  }
  0x11   : > { %612 = vperm.xlu0 (!%p162_p10), %1255, %v594_v14   ;;  %622 = vperm.xlu1 (!%p162_p10), %1256, %v596_v17   ;;  %v225_v21 = vld [vmem:[%s1943_s1 + $0x88] sm:$0xff] (!%p162_p10)  ;;  %v598_v23 = vld [vmem:[%s1944_s2 + $0x20] sm:$0xff] (!%p162_p10)  ;;  %v226_v25 = vld [vmem:[%s1943_s1 + $0x90] sm:$0xff] (!%p162_p10)  ;;  %s1889_s5 = scalar_lea.hbm (!%p162_p10), %s1945_s3, %s1183_s28  ;;  %s1389_s8 = sshll.u32 (!%p162_p10), %s1467_s7, 4  ;;  %s1390_s8 = int_to_ptr.vmem [resolvable:$false] %s1389_s8 }
  0x12   : > { %v599_v22 = vld [vmem:[%s1944_s2 + $0x28] sm:$0xff] (!%p162_p10)  ;;  %v601_v26 = vld [vmem:[%s1944_s2 + $0x38] sm:$0xff] (!%p162_p10)  ;;  %v600_v27 = vld [vmem:[%s1944_s2 + $0x30] sm:$0xff] (!%p162_p10)  ;;  %s1391_s9 = scalar_lea.vmem (!%p162_p10), %s1390_s8, 8192 }
  0x13   : > { %v211_v28 = vld [vmem:[%s1943_s1 + $0x18] sm:$0xff] (!%p162_p10)  ;;  %v603_v30 = vld [vmem:[%s1944_s2 + $0x48] sm:$0xff] (!%p162_p10)  ;;  %v602_v31 = vld [vmem:[%s1944_s2 + $0x40] sm:$0xff] (!%p162_p10) }
  0x14   : > { %v227_v29 = vld [vmem:[%s1943_s1 + $0x98] sm:$0xff] (!%p162_p10)  ;;  %v212_v32 = vld [vmem:[%s1943_s1 + $0x20] sm:$0xff] (!%p162_p10)  ;;  %v604_v35 = vld [vmem:[%s1944_s2 + $0x50] sm:$0xff] (!%p162_p10) }
  0x15   : > { %617 = vperm.xlu0 (!%p162_p10), %1255, %v595_v18   ;;  %627 = vperm.xlu1 (!%p162_p10), %1256, %v597_v19   ;;  %v228_v33 = vld [vmem:[%s1943_s1 + $0xa0] sm:$0xff] (!%p162_p10)  ;;  %v605_v34 = vld [vmem:[%s1944_s2 + $0x58] sm:$0xff] (!%p162_p10)  ;;  %v213_v36 = vld [vmem:[%s1943_s1 + $0x28] sm:$0xff] (!%p162_p10) }
  0x16   : > { %s191_s26 = scalar_select %p190_p11, %s1455_s15, 1  ;;  %v229_v37 = vld [vmem:[%s1943_s1 + $0xa8] sm:$0xff]  ;;  %v606_v39 = vld [vmem:[%s1944_s2 + $0x60] sm:$0xff]  ;;  %v214_v40 = vld [vmem:[%s1943_s1 + $0x30] sm:$0xff] }
  0x17   : > { %v607_v38 = vld [vmem:[%s1944_s2 + $0x68] sm:$0xff]  ;;  %v230_v41 = vld [vmem:[%s1943_s1 + $0xb0] sm:$0xff]  ;;  %v609_v42 = vld [vmem:[%s1944_s2 + $0x78] sm:$0xff]  ;;  %s1896_s15 = scalar_lea.sflag [#allocation3], %s186_s23 }
  0x18   : > { %s1182_s27 = sshll.u32 %s191_s26, 6  ;;  %v608_v43 = vld [vmem:[%s1944_s2 + $0x70] sm:$0xff]  ;;  %v215_v44 = vld [vmem:[%s1943_s1 + $0x38] sm:$0xff]  ;;  %v216_v46 = vld [vmem:[%s1943_s1 + $0x40] sm:$0xff]  ;;  %s1779_s26 = sshll.u32 %s186_s23, 8 }
  0x19   : > { %s197_s30 = scalar_lea.vmem %s1942_s0, %s1182_s27  ;;  %637 = vperm.xlu1 %1256, %v599_v22   ;;  %632 = vperm.xlu0 %1255, %v598_v23   ;;  %v231_v45 = vld [vmem:[%s1943_s1 + $0xb8] sm:$0xff]  ;;  %v232_v47 = vld [vmem:[%s1943_s1 + $0xc0] sm:$0xff]  ;;  %v217_v48 = vld [vmem:[%s1943_s1 + $0x48] sm:$0xff]  ;;  %s1791_s27 = scalar_lea.vmem [#allocation2], %s1779_s26 }
  0x1a   : > { %v201_v2 = vld [vmem:[%s197_s30 + $0x8] sm:$0xff]  ;;  %v203_v3 = vld [vmem:[%s197_s30 + $0x18] sm:$0xff]  ;;  %v200_v4 = vld [vmem:[%s197_s30] sm:$0xff]  ;;  %s1026_s29 = sshll.u32 %s1791_s27, 4  ;;  %s1891_s29 = int_to_ptr.vmem [resolvable:$true] %s1026_s29 }
  0x1b   : > { %v1184_v5 = vpack.c.bf16 %v203_v3, %v201_v2  ;;  %v202_v6 = vld [vmem:[%s197_s30 + $0x10] sm:$0xff]  ;;  %v205_v7 = vld [vmem:[%s197_s30 + $0x28] sm:$0xff]  ;;  %v207_v8 = vld [vmem:[%s197_s30 + $0x38] sm:$0xff]  ;;  %s1385_s6 = scalar_lea.vmem %s1891_s29, 4096  ;;  %p1392_p1 = scmp.lt.s32.totalorder %s1891_s29, %s1390_s8 }
  0x1c   : > { %v1186_v9 = vpack.c.bf16 %v202_v6, %v200_v4  ;;  %v1188_v10 = vpack.c.bf16 %v207_v8, %v205_v7  ;;  %v204_v11 = vld [vmem:[%s197_s30 + $0x20] sm:$0xff]  ;;  %v206_v12 = vld [vmem:[%s197_s30 + $0x30] sm:$0xff]  ;;  %v233_v49 = vld [vmem:[%s1943_s1 + $0xc8] sm:$0xff]  ;;  %p1386_p12 = scmp.ne.s32.totalorder %s1891_s29, %s1385_s6  ;;  %p1393_p2 = scmp.lt.s32.totalorder %s1391_s9, %s1385_s6 }
  0x1d   : > { %1185 = vmatprep.subr.bf16.mxu0 %v1184_v5  ;;  %1192 = vmatprep.subr.bf16.mxu1 %v1184_v5  ;;  %v1190_v13 = vpack.c.bf16 %v206_v12, %v204_v11  ;;  %v218_v50 = vld [vmem:[%s1943_s1 + $0x50] sm:$0xff]  ;;  %v219_v52 = vld [vmem:[%s1943_s1 + $0x58] sm:$0xff]  ;;  %v220_v54 = vld [vmem:[%s1943_s1 + $0x60] sm:$0xff] }
  0x1e   : > { %1187 = vmatpush1.bf16.msra.mxu0 %v1186_v9  ;;  %1194 = vmatpush1.bf16.msra.mxu1 %v1186_v9  ;;  %v234_v51 = vld [vmem:[%s1943_s1 + $0xd0] sm:$0xff]  ;;  %v235_v53 = vld [vmem:[%s1943_s1 + $0xd8] sm:$0xff]  ;;  %v236_v55 = vld [vmem:[%s1943_s1 + $0xe0] sm:$0xff]  ;;  %p1387_p13 = pnand %p1386_p12, %p1530_p4  ;;  %p1394_p3 = por %p1393_p2, %p1392_p1 }
  0x1f   : > { %1189 = vmatprep.subr.bf16.mxu0 %v1188_v10  ;;  %1193 = vmatprep.subr.bf16.mxu1 %v1188_v10  ;;  %v221_v56 = vld [vmem:[%s1943_s1 + $0x68] sm:$0xff]  ;;  %v222_v58 = vld [vmem:[%s1943_s1 + $0x70] sm:$0xff]  ;;  %v223_v60 = vld [vmem:[%s1943_s1 + $0x78] sm:$0xff] }
  0x20   : > { %647 = vperm.xlu1 %1256, %v601_v26   ;;  %642 = vperm.xlu0 %1255, %v600_v27   ;;  %v237_v57 = vld [vmem:[%s1943_s1 + $0xe8] sm:$0xff]  ;;  %v238_v59 = vld [vmem:[%s1943_s1 + $0xf0] sm:$0xff]  ;;  %v239_v61 = vld [vmem:[%s1943_s1 + $0xf8] sm:$0xff]  ;;  %p1388_p0 = pneg %p1387_p13 }
  0x22   : > { %1191 = vmatpush1.bf16.msra.mxu0 %v1190_v13  ;;  %1195 = vmatpush1.bf16.msra.mxu1 %v1190_v13  ;;  %p1395_p5 = pnand %p1394_p3, %p1388_p0 }
  0x24   : > { %657 = vperm.xlu1 %1256, %v603_v30   ;;  %652 = vperm.xlu0 %1255, %v602_v31  }
  0x25   : > { %1113 = vmatmul.mubr.msk.f32.vlgmr.msra.gmra.mrb[0].mxu0 %vm240_vm0, %v208_v15  ;;  %1129 = vmatmul.mubr.msk.f32.vlgmr.msra.gmra.mrb[0].mxu1 %vm240_vm0, %v224_v16 }
  0x26   : > { %407 = vmatprep.mubr.f32.mxu0 %v1465_v0  ;;  %503 = vmatprep.mubr.f32.mxu1 %v1465_v0 }
  0x28   : > { %667 = vperm.xlu1 %1256, %v605_v34   ;;  %662 = vperm.xlu0 %1255, %v604_v35  }
  0x29   : > { %1114 = vmatmul.mubr.msk.f32.gmra.mrb[2].mxu0 %vm240_vm0, %v209_v20  ;;  %1130 = vmatmul.mubr.msk.f32.gmra.mrb[2].mxu1 %vm240_vm0, %v225_v21 }
  0x2a   : > { %413 = vmatprep.mubr.f32.mxu0 %v1465_v0  ;;  %509 = vmatprep.mubr.f32.mxu1 %v1465_v0 }
  0x2c   : > { %677 = vperm.xlu1 %1256, %v607_v38   ;;  %672 = vperm.xlu0 %1255, %v606_v39  }
  0x2d   : > { %1115 = vmatmul.mubr.msk.f32.gmra.mrb[4].mxu0 %vm240_vm0, %v210_v24  ;;  %1131 = vmatmul.mubr.msk.f32.gmra.mrb[4].mxu1 %vm240_vm0, %v226_v25 }
  0x2e   : > { %419 = vmatprep.mubr.f32.mxu0 %v1465_v0  ;;  %515 = vmatprep.mubr.f32.mxu1 %v1465_v0 }
  0x30   : > { %687 = vperm.xlu1 %1256, %v609_v42   ;;  %682 = vperm.xlu0 %1255, %v608_v43  }
  0x31   : > { %1116 = vmatmul.mubr.msk.f32.gmra.mrb[6].mxu0 %vm240_vm0, %v211_v28  ;;  %1132 = vmatmul.mubr.msk.f32.gmra.mrb[6].mxu1 %vm240_vm0, %v227_v29 }
  0x32   : > { %425 = vmatprep.mubr.f32.mxu0 %v1465_v0  ;;  %521 = vmatprep.mubr.f32.mxu1 %v1465_v0 }
  0x35   : > { %1117 = vmatmul.mubr.msk.f32.gmra.mrb[8].mxu0 %vm240_vm0, %v212_v32  ;;  %1133 = vmatmul.mubr.msk.f32.gmra.mrb[8].mxu1 %vm240_vm0, %v228_v33 }
  0x36   : > { %431 = vmatprep.mubr.f32.mxu0 %v1465_v0  ;;  %527 = vmatprep.mubr.f32.mxu1 %v1465_v0 }
  0x39   : > { %1118 = vmatmul.mubr.msk.f32.gmra.mrb[10].mxu0 %vm240_vm0, %v213_v36  ;;  %1134 = vmatmul.mubr.msk.f32.gmra.mrb[10].mxu1 %vm240_vm0, %v229_v37 }
  0x3a   : > { %437 = vmatprep.mubr.f32.mxu0 %v1465_v0  ;;  %533 = vmatprep.mubr.f32.mxu1 %v1465_v0 }
  0x3d   : > { %1119 = vmatmul.mubr.msk.f32.gmra.mrb[12].mxu0 %vm240_vm0, %v214_v40  ;;  %1135 = vmatmul.mubr.msk.f32.gmra.mrb[12].mxu1 %vm240_vm0, %v230_v41 }
  0x3e   : > { %443 = vmatprep.mubr.f32.mxu0 %v1465_v0  ;;  %539 = vmatprep.mubr.f32.mxu1 %v1465_v0 }
  0x41   : > { %1120 = vmatmul.mubr.msk.f32.gmra.mrb[14].mxu0 %vm240_vm0, %v215_v44  ;;  %1136 = vmatmul.mubr.msk.f32.gmra.mrb[14].mxu1 %vm240_vm0, %v231_v45 }
  0x42   : > { %449 = vmatprep.mubr.f32.mxu0 %v1465_v0  ;;  %545 = vmatprep.mubr.f32.mxu1 %v1465_v0 }
  0x45   : > { %1121 = vmatmul.mubr.msk.f32.gmra.mrb[16].mxu0 %vm240_vm0, %v216_v46  ;;  %1137 = vmatmul.mubr.msk.f32.gmra.mrb[16].mxu1 %vm240_vm0, %v232_v47 }
  0x46   : > { %455 = vmatprep.mubr.f32.mxu0 %v1465_v0  ;;  %551 = vmatprep.mubr.f32.mxu1 %v1465_v0 }
  0x49   : > { %1122 = vmatmul.mubr.msk.f32.gmra.mrb[18].mxu0 %vm240_vm0, %v217_v48  ;;  %1138 = vmatmul.mubr.msk.f32.gmra.mrb[18].mxu1 %vm240_vm0, %v233_v49 }
  0x4a   : > { %461 = vmatprep.mubr.f32.mxu0 %v1465_v0  ;;  %557 = vmatprep.mubr.f32.mxu1 %v1465_v0 }
  0x4d   : > { %1123 = vmatmul.mubr.msk.f32.gmra.mrb[20].mxu0 %vm240_vm0, %v218_v50  ;;  %1139 = vmatmul.mubr.msk.f32.gmra.mrb[20].mxu1 %vm240_vm0, %v234_v51 }
  0x4e   : > { %467 = vmatprep.mubr.f32.mxu0 %v1465_v0  ;;  %563 = vmatprep.mubr.f32.mxu1 %v1465_v0 }
  0x51   : > { %1124 = vmatmul.mubr.msk.f32.gmra.mrb[22].mxu0 %vm240_vm0, %v219_v52  ;;  %1140 = vmatmul.mubr.msk.f32.gmra.mrb[22].mxu1 %vm240_vm0, %v235_v53 }
  0x52   : > { %473 = vmatprep.mubr.f32.mxu0 %v1465_v0  ;;  %569 = vmatprep.mubr.f32.mxu1 %v1465_v0 }
  0x55   : > { %1125 = vmatmul.mubr.msk.f32.gmra.mrb[24].mxu0 %vm240_vm0, %v220_v54  ;;  %1141 = vmatmul.mubr.msk.f32.gmra.mrb[24].mxu1 %vm240_vm0, %v236_v55 }
  0x56   : > { %479 = vmatprep.mubr.f32.mxu0 %v1465_v0  ;;  %575 = vmatprep.mubr.f32.mxu1 %v1465_v0 }
  0x59   : > { %1126 = vmatmul.mubr.msk.f32.gmra.mrb[26].mxu0 %vm240_vm0, %v221_v56  ;;  %1142 = vmatmul.mubr.msk.f32.gmra.mrb[26].mxu1 %vm240_vm0, %v237_v57 }
  0x5a   : > { %485 = vmatprep.mubr.f32.mxu0 %v1465_v0  ;;  %581 = vmatprep.mubr.f32.mxu1 %v1465_v0 }
  0x5d   : > { %1127 = vmatmul.mubr.msk.f32.gmra.mrb[28].mxu0 %vm240_vm0, %v222_v58  ;;  %1143 = vmatmul.mubr.msk.f32.gmra.mrb[28].mxu1 %vm240_vm0, %v238_v59 }
  0x5e   : > { %491 = vmatprep.mubr.f32.mxu0 %v1465_v0  ;;  %587 = vmatprep.mubr.f32.mxu1 %v1465_v0 }
  0x61   : > { %1128 = vmatmul.mubr.msk.f32.gmra.mrb[30].mxu0 %vm240_vm0, %v223_v60  ;;  %1144 = vmatmul.mubr.msk.f32.gmra.mrb[30].mxu1 %vm240_vm0, %v239_v61 }
  0x90   : > { %v613_v16 = vpop.permute.xlu0 %612  ;;  %v623_v52 = vpop.permute.xlu1 %622 }
  0x94   : > { %v618_v38 = vpop.permute.xlu0 %617 }
  0xf8   : > { %v499_v62 = vpop.f32.mrb[0].mxu1  ;;  %v403_v63 = vpop.f32.mrb[0].mxu0 }
  0xf9   : > { %v1145_v1 = vmul.f32 -1.442695, %v499_v62  ;;  %v501_v2 = vpop.f32.mrb[1].mxu1  ;;  %v405_v3 = vpop.f32.mrb[1].mxu0  ;;  %v690_v37 = vadd.f32 %v613_v16, %v403_v63 }
  0xfa   : > { %v1146_v4 = vmul.f32 -1.442695, %v501_v2  ;;  %v691_v40 = vadd.f32 %v613_v16, %v405_v3 }
  0xfb   : > { %1257 = vpow2.f32 %v1145_v1  ;;  %v722_v50 = vmax.f32 %v690_v37, 0.0 }
  0xfc   : > { %1259 = vpow2.f32 %v1146_v4  ;;  %v505_v0 = vpop.f32.mrb[2].mxu1  ;;  %v409_v5 = vpop.f32.mrb[2].mxu0  ;;  %v723_v53 = vmax.f32 %v691_v40, 0.0 }
  0xfd   : > { %v1147_v6 = vmul.f32 -1.442695, %v505_v0  ;;  %v507_v7 = vpop.f32.mrb[3].mxu1  ;;  %v1758_v8 = vpop.f32.mrb[3].mxu0  ;;  %v692_v51 = vadd.f32 %v618_v38, %v409_v5 }
  0xfe   : > { %v1148_v9 = vmul.f32 -1.442695, %v507_v7  ;;  %v693_v55 = vadd.f32 %v618_v38, %v1758_v8 }
  0xff   : > { %1261 = vpow2.f32 %v1147_v6  ;;  %v724_v3 = vmax.f32 %v692_v51, 0.0 }
 0x100   : > { %1263 = vpow2.f32 %v1148_v9  ;;  %v511_v10 = vpop.f32.mrb[4].mxu1  ;;  %v1760_v11 = vpop.f32.mrb[4].mxu0  ;;  %v725_v6 = vmax.f32 %v693_v55, 0.0 }
 0x101   : > { %v1149_v12 = vmul.f32 -1.442695, %v511_v10  ;;  %v513_v13 = vpop.f32.mrb[5].mxu1  ;;  %v1762_v14 = vpop.f32.mrb[5].mxu0  ;;  %v694_v4 = vadd.f32 %v623_v52, %v1760_v11 }
 0x102   : > { %v1150_v15 = vmul.f32 -1.442695, %v513_v13  ;;  %v695_v8 = vadd.f32 %v623_v52, %v1762_v14  ;;  %v628_v14 = vpop.permute.xlu1 %627 }
 0x103   : > { %1265 = vpow2.f32 %v1149_v12 }
 0x104   : > { %1267 = vpow2.f32 %v1150_v15  ;;  %v517_v17 = vpop.f32.mrb[6].mxu1  ;;  %v1764_v18 = vpop.f32.mrb[6].mxu0 }
 0x105   : > { %v1258_v19 = vpop.eup %1257  ;;  %v1151_v20 = vmul.f32 -1.442695, %v517_v17  ;;  %v519_v21 = vpop.f32.mrb[7].mxu1 }
 0x106   : > { %v1766_v22 = vpop.f32.mrb[7].mxu0  ;;  %v1260_v23 = vpop.eup %1259  ;;  %v850_v24 = vadd.f32 1.0, %v1258_v19  ;;  %v1152_v25 = vmul.f32 -1.442695, %v519_v21 }
 0x107   : > { %v851_v26 = vadd.f32 1.0, %v1260_v23  ;;  %1269 = vpow2.f32 %v1151_v20  ;;  %v726_v23 = vmax.f32 %v694_v4, 0.0  ;;  %v697_v37 = vadd.f32 %v628_v14, %v1766_v22 }
 0x108   : > { %1271 = vrcp.f32 %v850_v24  ;;  %v523_v27 = vpop.f32.mrb[8].mxu1  ;;  %v1768_v28 = vpop.f32.mrb[8].mxu0  ;;  %v696_v24 = vadd.f32 %v628_v14, %v1764_v18 }
 0x109   : > { %v1262_v29 = vpop.eup %1261  ;;  %1273 = vrcp.f32 %v851_v26  ;;  %v1153_v30 = vmul.f32 -1.442695, %v523_v27  ;;  %v525_v31 = vpop.f32.mrb[9].mxu1 }
 0x10a   : > { %v1770_v32 = vpop.f32.mrb[9].mxu0  ;;  %v1264_v33 = vpop.eup %1263  ;;  %v852_v34 = vadd.f32 1.0, %v1262_v29  ;;  %1275 = vpow2.f32 %v1152_v25  ;;  %v1154_v35 = vmul.f32 -1.442695, %v525_v31  ;;  %v727_v29 = vmax.f32 %v695_v8, 0.0 }
 0x10b   : > { %v853_v36 = vadd.f32 1.0, %v1264_v33  ;;  %1277 = vpow2.f32 %v1153_v30  ;;  %v633_v25 = vpop.permute.xlu0 %632 }
 0x10c   : > { %1279 = vrcp.f32 %v852_v34  ;;  %v529_v39 = vpop.f32.mrb[10].mxu1  ;;  %v1773_v41 = vpop.f32.mrb[10].mxu0 }
 0x10d   : > { %v1266_v42 = vpop.eup %1265  ;;  %1281 = vrcp.f32 %v853_v36  ;;  %v1155_v43 = vmul.f32 -1.442695, %v529_v39  ;;  %v531_v44 = vpop.f32.mrb[11].mxu1 }
 0x10e   : > { %v1775_v45 = vpop.f32.mrb[11].mxu0  ;;  %v1268_v46 = vpop.eup %1267  ;;  %v854_v47 = vadd.f32 1.0, %v1266_v42  ;;  %1283 = vpow2.f32 %v1154_v35  ;;  %v1156_v48 = vmul.f32 -1.442695, %v531_v44  ;;  %v698_v42 = vadd.f32 %v633_v25, %v1768_v28 }
 0x10f   : > { %v855_v49 = vadd.f32 1.0, %v1268_v46  ;;  %1285 = vpow2.f32 %v1155_v43  ;;  %v728_v46 = vmax.f32 %v696_v24, 0.0 }
 0x110   : > { %1287 = vrcp.f32 %v854_v47  ;;  %v535_v54 = vpop.f32.mrb[12].mxu1  ;;  %v1782_v56 = vpop.f32.mrb[12].mxu0 }
 0x111   : > { %v1270_v57 = vpop.eup %1269  ;;  %1289 = vrcp.f32 %v855_v49  ;;  %v1157_v58 = vmul.f32 -1.442695, %v535_v54  ;;  %v537_v59 = vpop.f32.mrb[13].mxu1 }
 0x112   : > { %v1784_v60 = vpop.f32.mrb[13].mxu0  ;;  %v1272_v61 = vpop.eup %1271  ;;  %v856_v62 = vadd.f32 1.0, %v1270_v57  ;;  %1291 = vpow2.f32 %v1156_v48  ;;  %v1158_v63 = vmul.f32 -1.442695, %v537_v59 }
 0x113   : > { %v1274_v1 = vpop.eup %1273  ;;  %v946_v2 = vmul.f32 %v1272_v61, %v722_v50  ;;  %1293 = vpow2.f32 %v1157_v58  ;;  %v729_v58 = vmax.f32 %v697_v37, 0.0  ;;  %v638_v59 = vpop.permute.xlu1 %637  ;;  %v730_v61 = vmax.f32 %v698_v42, 0.0 }
 0x114   : > { %v1276_v0 = vpop.eup %1275  ;;  %1295 = vrcp.f32 %v856_v62  ;;  %v947_v5 = vmul.f32 %v1274_v1, %v723_v53  ;;  %v541_v7 = vpop.f32.mrb[14].mxu1  ;;  %v699_v53 = vadd.f32 %v633_v25, %v1770_v32 }
 0x115   : > { %v1788_v9 = vpop.f32.mrb[14].mxu0  ;;  %v1278_v10 = vpop.eup %1277  ;;  %v857_v12 = vadd.f32 1.0, %v1276_v0  ;;  %978 = vst [vmem:[%s1791_s27] sm:$0xff] %v946_v2  ;;  %1297 = vpow2.f32 %v1158_v63  ;;  %v1159_v13 = vmul.f32 -1.442695, %v541_v7  ;;  %v700_v2 = vadd.f32 %v638_v59, %v1773_v41 }
 0x116   : > { %v543_v15 = vpop.f32.mrb[15].mxu1  ;;  %v1794_v11 = vpop.f32.mrb[15].mxu0  ;;  %v858_v17 = vadd.f32 1.0, %v1278_v10  ;;  %979 = vst [vmem:[%s1791_s27 + $0x8] sm:$0xff] %v947_v5  ;;  %v731_v5 = vmax.f32 %v699_v53, 0.0  ;;  %v701_v41 = vadd.f32 %v638_v59, %v1775_v45 }
 0x117   : > { %v1280_v16 = vpop.eup %1279  ;;  %v1160_v19 = vmul.f32 -1.442695, %v543_v15  ;;  %1299 = vrcp.f32 %v857_v12 }
 0x118   : > { %v1282_v20 = vpop.eup %1281  ;;  %v948_v21 = vmul.f32 %v1280_v16, %v724_v3  ;;  %1301 = vrcp.f32 %v858_v17  ;;  %v547_v30 = vpop.f32.mrb[16].mxu1 }
 0x119   : > { %v1284_v26 = vpop.eup %1283  ;;  %v949_v27 = vmul.f32 %v1282_v20, %v725_v6  ;;  %v1798_v31 = vpop.f32.mrb[16].mxu0  ;;  %1303 = vpow2.f32 %v1159_v13  ;;  %v1161_v35 = vmul.f32 -1.442695, %v547_v30 }
 0x11a   : > { %v1286_v33 = vpop.eup %1285  ;;  %v859_v34 = vadd.f32 1.0, %v1284_v26  ;;  %980 = vst [vmem:[%s1791_s27 + $0x10] sm:$0xff] %v948_v21  ;;  %v549_v36 = vpop.f32.mrb[17].mxu1  ;;  %1305 = vpow2.f32 %v1160_v19  ;;  %v732_v19 = vmax.f32 %v700_v2, 0.0 }
 0x11b   : > { %v1802_v38 = vpop.f32.mrb[17].mxu0  ;;  %v1288_v18 = vpop.eup %1287  ;;  %v860_v39 = vadd.f32 1.0, %v1286_v33  ;;  %981 = vst [vmem:[%s1791_s27 + $0x18] sm:$0xff] %v949_v27  ;;  %v1162_v40 = vmul.f32 -1.442695, %v549_v36 }
 0x11c   : > { %v1290_v43 = vpop.eup %1289  ;;  %1307 = vrcp.f32 %v859_v34  ;;  %v950_v44 = vmul.f32 %v1288_v18, %v726_v23  ;;  %v553_v49 = vpop.f32.mrb[18].mxu1  ;;  %v733_v34 = vmax.f32 %v701_v41, 0.0 }
 0x11d   : > { %v1292_v47 = vpop.eup %1291  ;;  %1309 = vrcp.f32 %v860_v39  ;;  %v951_v48 = vmul.f32 %v1290_v43, %v727_v29  ;;  %v1806_v22 = vpop.f32.mrb[18].mxu0  ;;  %v1163_v52 = vmul.f32 -1.442695, %v553_v49 }
 0x11e   : > { %v1294_v50 = vpop.eup %1293  ;;  %v861_v51 = vadd.f32 1.0, %v1292_v47  ;;  %982 = vst [vmem:[%s1791_s27 + $0x20] sm:$0xff] %v950_v44  ;;  %1311 = vpow2.f32 %v1161_v35  ;;  %v555_v54 = vpop.f32.mrb[19].mxu1 }
 0x11f   : > { %v1810_v28 = vpop.f32.mrb[19].mxu0  ;;  %v1296_v55 = vpop.eup %1295  ;;  %v862_v57 = vadd.f32 1.0, %v1294_v50  ;;  %983 = vst [vmem:[%s1791_s27 + $0x28] sm:$0xff] %v951_v48  ;;  %1313 = vpow2.f32 %v1162_v40  ;;  %v1164_v1 = vmul.f32 -1.442695, %v555_v54 }
 0x120   : > { %v1298_v62 = vpop.eup %1297  ;;  %1315 = vrcp.f32 %v861_v51  ;;  %v952_v63 = vmul.f32 %v1296_v55, %v728_v46  ;;  %v559_v32 = vpop.f32.mrb[20].mxu1 }
 0x121   : > { %1317 = vrcp.f32 %v862_v57  ;;  %v863_v3 = vadd.f32 1.0, %v1298_v62  ;;  %v1814_v4 = vpop.f32.mrb[20].mxu0  ;;  %v1300_v0 = vpop.eup %1299  ;;  %v1165_v6 = vmul.f32 -1.442695, %v559_v32 }
 0x122   : > { %984 = vst [vmem:[%s1791_s27 + $0x30] sm:$0xff] %v952_v63  ;;  %1319 = vpow2.f32 %v1163_v52  ;;  %v561_v7 = vpop.f32.mrb[21].mxu1  ;;  %v1817_v8 = vpop.f32.mrb[21].mxu0  ;;  %v953_v12 = vmul.f32 %v1300_v0, %v729_v58 }
 0x123   : > { %v1302_v10 = vpop.eup %1301  ;;  %1321 = vrcp.f32 %v863_v3  ;;  %v643_v13 = vpop.permute.xlu0 %642  ;;  %v1166_v15 = vmul.f32 -1.442695, %v561_v7 }
 0x124   : > { %v1304_v16 = vpop.eup %1303  ;;  %v954_v17 = vmul.f32 %v1302_v10, %v730_v61  ;;  %1323 = vpow2.f32 %v1164_v1  ;;  %v702_v14 = vadd.f32 %v643_v13, %v1782_v56  ;;  %985 = vst [vmem:[%s1791_s27 + $0x38] sm:$0xff] %v953_v12  ;;  %v565_v23 = vpop.f32.mrb[22].mxu1  ;;  %v703_v27 = vadd.f32 %v643_v13, %v1784_v60 }
 0x125   : > { %v1306_v20 = vpop.eup %1305  ;;  %v864_v21 = vadd.f32 1.0, %v1304_v16  ;;  %1325 = vpow2.f32 %v1165_v6  ;;  %v1822_v24 = vpop.f32.mrb[22].mxu0  ;;  %v1167_v45 = vmul.f32 -1.442695, %v565_v23 }
 0x126   : > { %v1308_v25 = vpop.eup %1307  ;;  %v865_v26 = vadd.f32 1.0, %v1306_v20  ;;  %986 = vst [vmem:[%s1791_s27 + $0x40] sm:$0xff] %v954_v17  ;;  %1327 = vpow2.f32 %v1166_v15  ;;  %v567_v29 = vpop.f32.mrb[23].mxu1  ;;  %v734_v39 = vmax.f32 %v702_v14, 0.0  ;;  %v735_v48 = vmax.f32 %v703_v27, 0.0 }
 0x127   : > { %v1826_v30 = vpop.f32.mrb[23].mxu0  ;;  %v1310_v33 = vpop.eup %1309  ;;  %1329 = vrcp.f32 %v864_v21  ;;  %v955_v56 = vmul.f32 %v1308_v25, %v731_v5  ;;  %v1168_v35 = vmul.f32 -1.442695, %v567_v29 }
 0x128   : > { %v1312_v36 = vpop.eup %1311  ;;  %1331 = vrcp.f32 %v865_v26  ;;  %v956_v37 = vmul.f32 %v1310_v33, %v732_v19  ;;  %v648_v18 = vpop.permute.xlu1 %647 }
 0x129   : > { %v1314_v40 = vpop.eup %1313  ;;  %v866_v42 = vadd.f32 1.0, %v1312_v36  ;;  %987 = vst [vmem:[%s1791_s27 + $0x48] sm:$0xff] %v955_v56  ;;  %v704_v60 = vadd.f32 %v648_v18, %v1788_v9  ;;  %1333 = vpow2.f32 %v1167_v45  ;;  %v571_v43 = vpop.f32.mrb[24].mxu1  ;;  %v705_v9 = vadd.f32 %v648_v18, %v1794_v11 }
 0x12a   : > { %v1830_v44 = vpop.f32.mrb[24].mxu0  ;;  %v1316_v46 = vpop.eup %1315  ;;  %v867_v47 = vadd.f32 1.0, %v1314_v40  ;;  %988 = vst [vmem:[%s1791_s27 + $0x50] sm:$0xff] %v956_v37  ;;  %1335 = vpow2.f32 %v1168_v35  ;;  %v1169_v49 = vmul.f32 -1.442695, %v571_v43 }
 0x12b   : > { %v573_v50 = vpop.f32.mrb[25].mxu1  ;;  %v1833_v51 = vpop.f32.mrb[25].mxu0  ;;  %1337 = vrcp.f32 %v866_v42  ;;  %v957_v53 = vmul.f32 %v1316_v46, %v733_v34  ;;  %v736_v62 = vmax.f32 %v704_v60, 0.0  ;;  %v737_v10 = vmax.f32 %v705_v9, 0.0 }
 0x12c   : > { %v1318_v52 = vpop.eup %1317  ;;  %v1170_v54 = vmul.f32 -1.442695, %v573_v50  ;;  %1339 = vrcp.f32 %v867_v47  ;;  %v653_v58 = vpop.permute.xlu0 %652 }
 0x12d   : > { %v1320_v55 = vpop.eup %1319  ;;  %v958_v57 = vmul.f32 %v1318_v52, %v734_v39  ;;  %989 = vst [vmem:[%s1791_s27 + $0x58] sm:$0xff] %v957_v53  ;;  %1341 = vpow2.f32 %v1169_v49  ;;  %v577_v63 = vpop.f32.mrb[26].mxu1  ;;  %v706_v32 = vadd.f32 %v653_v58, %v1798_v31  ;;  %v707_v12 = vadd.f32 %v653_v58, %v1802_v38 }
 0x12e   : > { %v1322_v59 = vpop.eup %1321  ;;  %v868_v61 = vadd.f32 1.0, %v1320_v55  ;;  %v1837_v1 = vpop.f32.mrb[26].mxu0  ;;  %1343 = vpow2.f32 %v1170_v54  ;;  %v1171_v11 = vmul.f32 -1.442695, %v577_v63 }
 0x12f   : > { %v1324_v2 = vpop.eup %1323  ;;  %990 = vst [vmem:[%s1791_s27 + $0x60] sm:$0xff] %v958_v57  ;;  %v959_v3 = vmul.f32 %v1322_v59, %v735_v48  ;;  %v579_v0 = vpop.f32.mrb[27].mxu1  ;;  %v738_v23 = vmax.f32 %v706_v32, 0.0  ;;  %v739_v29 = vmax.f32 %v707_v12, 0.0 }
 0x130   : > { %v1841_v5 = vpop.f32.mrb[27].mxu0  ;;  %v1326_v6 = vpop.eup %1325  ;;  %1345 = vrcp.f32 %v868_v61  ;;  %v869_v7 = vadd.f32 1.0, %v1324_v2  ;;  %v1172_v16 = vmul.f32 -1.442695, %v579_v0 }
 0x131   : > { %v1328_v13 = vpop.eup %1327  ;;  %v870_v41 = vadd.f32 1.0, %v1326_v6  ;;  %991 = vst [vmem:[%s1791_s27 + $0x68] sm:$0xff] %v959_v3  ;;  %v658_v15 = vpop.permute.xlu1 %657  ;;  %1347 = vpow2.f32 %v1171_v11 }
 0x132   : > { %v1330_v17 = vpop.eup %1329  ;;  %1349 = vrcp.f32 %v869_v7  ;;  %v871_v31 = vadd.f32 1.0, %v1328_v13  ;;  %v1845_v19 = vpop.f32.mrb[28].mxu0  ;;  %v708_v33 = vadd.f32 %v658_v15, %v1806_v22  ;;  %v709_v43 = vadd.f32 %v658_v15, %v1810_v28 }
 0x133   : > { %v583_v14 = vpop.f32.mrb[28].mxu1  ;;  %v1332_v20 = vpop.eup %1331  ;;  %1351 = vrcp.f32 %v870_v41  ;;  %v960_v21 = vmul.f32 %v1330_v17, %v736_v62 }
 0x134   : > { %v1173_v25 = vmul.f32 -1.442695, %v583_v14  ;;  %v1847_v38 = vpop.f32.mrb[29].mxu0  ;;  %v585_v26 = vpop.f32.mrb[29].mxu1  ;;  %1353 = vrcp.f32 %v871_v31  ;;  %v961_v45 = vmul.f32 %v1332_v20, %v737_v10  ;;  %v740_v50 = vmax.f32 %v708_v33, 0.0 }
 0x135   : > { %v1334_v27 = vpop.eup %1333  ;;  %992 = vst [vmem:[%s1791_s27 + $0x70] sm:$0xff] %v960_v21  ;;  %v663_v35 = vpop.permute.xlu0 %662  ;;  %1355 = vpow2.f32 %v1172_v16  ;;  %v1174_v36 = vmul.f32 -1.442695, %v585_v26  ;;  %v741_v62 = vmax.f32 %v709_v43, 0.0 }
 0x136   : > { %v1336_v56 = vpop.eup %1335  ;;  %v872_v34 = vadd.f32 1.0, %v1334_v27  ;;  %993 = vst [vmem:[%s1791_s27 + $0x78] sm:$0xff] %v961_v45  ;;  %1357 = vpow2.f32 %v1173_v25  ;;  %v1852_v39 = vpop.f32.mrb[30].mxu0  ;;  %v710_v52 = vadd.f32 %v663_v35, %v1814_v4  ;;  %v711_v54 = vadd.f32 %v663_v35, %v1817_v8 }
 0x137   : > { %v1338_v37 = vpop.eup %1337  ;;  %v873_v18 = vadd.f32 1.0, %v1336_v56  ;;  %v589_v40 = vpop.f32.mrb[30].mxu1 }
 0x138   : > { %v1340_v42 = vpop.eup %1339  ;;  %v962_v60 = vmul.f32 %v1338_v37, %v738_v23  ;;  %1359 = vrcp.f32 %v872_v34  ;;  %v1175_v22 = vmul.f32 -1.442695, %v589_v40  ;;  %v1855_v46 = vpop.f32.mrb[31].mxu0  ;;  %v742_v4 = vmax.f32 %v710_v52, 0.0 }
 0x139   : > { %v591_v47 = vpop.f32.mrb[31].mxu1  ;;  %v1342_v48 = vpop.eup %1341  ;;  %v963_v49 = vmul.f32 %v1340_v42, %v739_v29  ;;  %1361 = vrcp.f32 %v873_v18  ;;  %v743_v11 = vmax.f32 %v711_v54, 0.0 }
 0x13a   : > { %v1344_v53 = vpop.eup %1343  ;;  %994 = vst [vmem:[%s1791_s27 + $0x80] sm:$0xff] %v962_v60  ;;  %v874_v9 = vadd.f32 1.0, %v1342_v48  ;;  %1363 = vpow2.f32 %v1174_v36  ;;  %v1176_v55 = vmul.f32 -1.442695, %v591_v47  ;;  %v668_v61 = vpop.permute.xlu1 %667 }
 0x13b   : > { %v1346_v28 = vpop.eup %1345  ;;  %995 = vst [vmem:[%s1791_s27 + $0x88] sm:$0xff] %v963_v49  ;;  %v875_v57 = vadd.f32 1.0, %v1344_v53  ;;  %1365 = vpow2.f32 %v1175_v22  ;;  %v712_v2 = vadd.f32 %v668_v61, %v1822_v24  ;;  %v713_v0 = vadd.f32 %v668_v61, %v1826_v30  ;;  %v673_v13 = vpop.permute.xlu0 %672 }
 0x13c   : > { %v1348_v58 = vpop.eup %1347  ;;  %v964_v59 = vmul.f32 %v1346_v28, %v740_v50  ;;  %1367 = vrcp.f32 %v874_v9  ;;  %v714_v15 = vadd.f32 %v673_v13, %v1830_v44  ;;  %v715_v30 = vadd.f32 %v673_v13, %v1833_v51 }
 0x13d   : > { %v1350_v63 = vpop.eup %1349  ;;  %1369 = vrcp.f32 %v875_v57  ;;  %v876_v8 = vadd.f32 1.0, %v1348_v58  ;;  %v744_v24 = vmax.f32 %v712_v2, 0.0  ;;  %v745_v31 = vmax.f32 %v713_v0, 0.0 }
 0x13e   : > { %v1352_v3 = vpop.eup %1351  ;;  %996 = vst [vmem:[%s1791_s27 + $0x90] sm:$0xff] %v964_v59  ;;  %v965_v32 = vmul.f32 %v1350_v63, %v741_v62  ;;  %1371 = vpow2.f32 %v1176_v55  ;;  %v678_v23 = vpop.permute.xlu1 %677  ;;  %v746_v44 = vmax.f32 %v714_v15, 0.0  ;;  %v747_v56 = vmax.f32 %v715_v30, 0.0 }
 0x13f   : > { %v1354_v6 = vpop.eup %1353  ;;  %v966_v7 = vmul.f32 %v1352_v3, %v742_v4  ;;  %1373 = vrcp.f32 %v876_v8  ;;  %v716_v27 = vadd.f32 %v678_v23, %v1837_v1  ;;  %v683_v51 = vpop.permute.xlu0 %682  ;;  %v717_v1 = vadd.f32 %v678_v23, %v1841_v5 }
 0x140   : > { %v1356_v10 = vpop.eup %1355  ;;  %997 = vst [vmem:[%s1791_s27 + $0x98] sm:$0xff] %v965_v32  ;;  %v967_v12 = vmul.f32 %v1354_v6, %v743_v11  ;;  %v718_v60 = vadd.f32 %v683_v51, %v1845_v19  ;;  %v719_v49 = vadd.f32 %v683_v51, %v1847_v38 }
 0x141   : > { %v1358_v41 = vpop.eup %1357  ;;  %998 = vst [vmem:[%s1791_s27 + $0xa0] sm:$0xff] %v966_v7  ;;  %v877_v16 = vadd.f32 1.0, %v1356_v10  ;;  %v748_v40 = vmax.f32 %v716_v27, 0.0  ;;  %v749_v48 = vmax.f32 %v717_v1, 0.0 }
 0x142   : > { %v1360_v17 = vpop.eup %1359  ;;  %999 = vst [vmem:[%s1791_s27 + $0xa8] sm:$0xff] %v967_v12  ;;  %v878_v14 = vadd.f32 1.0, %v1358_v41  ;;  %v688_v47 = vpop.permute.xlu1 %687  ;;  %v750_v5 = vmax.f32 %v718_v60, 0.0  ;;  %v751_v54 = vmax.f32 %v719_v49, 0.0 }
 0x143   : > { %v1362_v20 = vpop.eup %1361  ;;  %v968_v21 = vmul.f32 %v1360_v17, %v744_v24  ;;  %1375 = vrcp.f32 %v877_v16  ;;  %v720_v52 = vadd.f32 %v688_v47, %v1852_v39  ;;  %v721_v55 = vadd.f32 %v688_v47, %v1855_v46 }
 0x144   : > { %v1364_v25 = vpop.eup %1363  ;;  %v969_v26 = vmul.f32 %v1362_v20, %v745_v31  ;;  %1377 = vrcp.f32 %v878_v14 }
 0x145   : > { %v1366_v45 = vpop.eup %1365  ;;  %1000 = vst [vmem:[%s1791_s27 + $0xb0] sm:$0xff] %v968_v21  ;;  %v879_v29 = vadd.f32 1.0, %v1364_v25  ;;  %v752_v57 = vmax.f32 %v720_v52, 0.0  ;;  %v753_v39 = vmax.f32 %v721_v55, 0.0 }
 0x146   : > { %v1368_v33 = vpop.eup %1367  ;;  %1001 = vst [vmem:[%s1791_s27 + $0xb8] sm:$0xff] %v969_v26  ;;  %v880_v34 = vadd.f32 1.0, %v1366_v45 }
 0x147   : > { %v1370_v35 = vpop.eup %1369  ;;  %v970_v36 = vmul.f32 %v1368_v33, %v746_v44  ;;  %1379 = vrcp.f32 %v879_v29 }
 0x148   : > { %v1372_v37 = vpop.eup %1371  ;;  %v971_v18 = vmul.f32 %v1370_v35, %v747_v56  ;;  %1381 = vrcp.f32 %v880_v34 }
 0x149   : > { %v1374_v42 = vpop.eup %1373  ;;  %1002 = vst [vmem:[%s1791_s27 + $0xc0] sm:$0xff] %v970_v36  ;;  %v881_v43 = vadd.f32 1.0, %v1372_v37 }
 0x14a   : > { %1003 = vst [vmem:[%s1791_s27 + $0xc8] sm:$0xff] %v971_v18  ;;  %v972_v22 = vmul.f32 %v1374_v42, %v748_v40 }
 0x14b   : > { %1383 = vrcp.f32 %v881_v43 }
 0x14c   : > { %1004 = vst [vmem:[%s1791_s27 + $0xd0] sm:$0xff] %v972_v22 }
 0x14d   : > { %v1376_v50 = vpop.eup %1375 }
 0x14e   : > { %v1378_v53 = vpop.eup %1377  ;;  %v973_v9 = vmul.f32 %v1376_v50, %v749_v48 }
 0x14f   : > { %v974_v19 = vmul.f32 %v1378_v53, %v750_v5 }
 0x150   : > { %1005 = vst [vmem:[%s1791_s27 + $0xd8] sm:$0xff] %v973_v9 }
 0x151   : > { %v1380_v28 = vpop.eup %1379  ;;  %1006 = vst [vmem:[%s1791_s27 + $0xe0] sm:$0xff] %v974_v19 }
 0x152   : > { %v1382_v38 = vpop.eup %1381  ;;  %v975_v58 = vmul.f32 %v1380_v28, %v751_v54 }
 0x153   : > { %v976_v59 = vmul.f32 %v1382_v38, %v752_v57 }
 0x154   : > { %1007 = vst [vmem:[%s1791_s27 + $0xe8] sm:$0xff] %v975_v58 }
 0x155   : > { %v1384_v61 = vpop.eup %1383  ;;  %1008 = vst [vmem:[%s1791_s27 + $0xf0] sm:$0xff] %v976_v59 }
 0x156   : > { %v977_v46 = vmul.f32 %v1384_v61, %v753_v39 }
 0x158   : > { %1009 = vst [vmem:[%s1791_s27 + $0xf8] sm:$0xff] %v977_v46 }
 0x159   : > { %1398 = shalt.err (!%p1395_p5)
}
 0x15a   : > { %s1399_s10 = scalar_lea.hbm %s1889_s5, 4096  ;;  %s1403_s19 = scalar_lea.hbm %s1945_s3, 8192 }
 0x15b   : > { %p1400_p6 = scmp.ne.s32.totalorder %s1889_s5, %s1399_s10  ;;  %p1404_p10 = scmp.lt.u32.totalorder %s1889_s5, %s1945_s3 }
 0x15c   : > { %p1405_p11 = scmp.lt.u32.totalorder %s1403_s19, %s1399_s10  ;;  %p1407_p13 = scmp.lt.u32.totalorder %s1399_s10, %s1889_s5 }
 0x15d   : > { %p1401_p7 = pnand %p1400_p6, %p1530_p4 }
 0x15e   : > { %p1406_p12 = por %p1405_p11, %p1404_p10 }
 0x15f   : > { %p1402_p9 = pneg %p1401_p7 }
 0x160   : > { %p1408_p0 = por %p1407_p13, %p1406_p12 }
 0x162   : > { %p1409_p1 = pnand %p1408_p0, %p1402_p9 }
 0x164   : > { %1412 = shalt.err (!%p1409_p1)
}
 0x165   : > { %s1468_s26 = smov 256   ;;  %s1469_s27 = smov 16  }
 0x166   : > { %1196 = dma.vmem_to_hbm [thread:$0]  (%p1530_p4), %s1891_s29, 4096, %s1889_s5, %s1896_s15, %s1468_s26, %s1468_s26, %s1469_s27  }
 0x167 PF: > { %p1202_p2 = scmp.ge.s32.totalorder %s1463_s17, 2  ;;  %s1041_s28 = sand.u32 1, %s1443_s12  }
 0x168   : > { %s1042_s30 = scalar_lea.sflag [#allocation3], %s1041_s28 }
 0x169   : > { %p1199_p3 = pnand %p1202_p2, %p1537_p8 }
 0x16b   : > { %1438 = dma.done.wait (!%p1199_p3), %s1042_s30, 4096  }
 0x16c   : > { %1440 = vsyncadd (!%p1199_p3), %s1042_s30, 4294963200  ;;  %s16_s17 = sadd.s32 1, %s1463_s17   ;;  %s1948_s12 = smov %s1447_s13 }
 0x16d   : > { %p13_p5 = scmp.ge.s32.totalorder %s16_s17, 4   ;;  %s1949_s13 = smov %s1451_s14 }
 0x16e   : > { %s1950_s14 = smov %s1543_s25  ;;  %s1951_s15 = smov %s1459_s16 }
 0x16f   : > { %s1952_s16 = smov %s1954_s20  ;;  %15 = sbr.rel (!%p13_p5) target bundleno = 4 (0x4), region = 67 }
 0x176   :  { %1047 = vsyncpa [#allocation3], 1 }
 0x177   :  { %1049 = vsyncpa [#allocation3 + $0x1], 1 }

</bundles_post_ra>
